<compile_context>
chip_gen: v7x
topology: tpu7x:2x2x1
jax: 0.10.0
libtpu: 0.0.40
codegen_flags: <defaults>
</compile_context>

<pallas_src>
import functools

import jax
import jax.numpy as jnp
from jax.experimental import pallas as pl
from jax.experimental.pallas import tpu as pltpu


def _round_up(x, m):
    return (x + m - 1) // m * m


def _pick_tile(n, cands):
    for c in cands:
        if n % c == 0:
            return c
    return n


# -----------------------------------------------------------------------------
# Spiking dense kernel (single K block, bias pre-folded):
#   hidden:  o = min( tj @ W + b, t_max )      with b = t_max - D_i - t_min*sum(W,0)
#   output:  o = b - tj @ W                    with b = D_i + t_min*sum(W,0)
# -----------------------------------------------------------------------------
def _spiking_dense_kernel(tj_ref, w_ref, b_ref, o_ref, *, t_max, output_layer):
    acc = jnp.dot(tj_ref[...], w_ref[...], preferred_element_type=jnp.float32)
    b = b_ref[...]                       # (1, tn) f32 row, broadcasts over rows
    if output_layer:
        out = b - acc                    # == D_i + (t_min - tj) @ W
    else:
        out = jnp.minimum(acc + b, t_max)  # torch.where(ti < t_max, ti, t_max)
    o_ref[...] = out.astype(o_ref.dtype)


def spiking_dense(tj_p, w_p, b_p, *, t_max, output_layer, out_dtype):
    """tj_p: (Mp, Kp) bf16, w_p: (Kp, Np) bf16, b_p: (1, Np) f32; all pre-padded."""
    Mp, Kp = tj_p.shape
    Kw, Np = w_p.shape
    assert Kp == Kw and Mp % 8 == 0 and Np % 128 == 0

    # Whole K per block; tile M/N.  (For big M keep >=2 M-blocks so both v7x
    # TensorCores get work via the "parallel" axis.)
    tm = _pick_tile(Mp, (512, 256, 128, 64, 32, 16, 8))
    tn = _pick_tile(Np, (512, 384, 256, 128))

    kernel = functools.partial(_spiking_dense_kernel, t_max=float(t_max),
                               output_layer=output_layer)
    return pl.pallas_call(
        kernel,
        out_shape=jax.ShapeDtypeStruct((Mp, Np), out_dtype),
        grid_spec=pltpu.PrefetchScalarGridSpec(
            num_scalar_prefetch=0,
            grid=(Mp // tm, Np // tn),
            in_specs=[pl.BlockSpec((tm, Kp), lambda i, j: (i, 0)),
                      pl.BlockSpec((Kp, tn), lambda i, j: (0, j)),
                      pl.BlockSpec((1, tn), lambda i, j: (0, j))],
            out_specs=pl.BlockSpec((tm, tn), lambda i, j: (i, j)),
        ),
        compiler_params=pltpu.CompilerParams(
            dimension_semantics=("parallel", "parallel")),
    )(tj_p, w_p, b_p)


# -----------------------------------------------------------------------------
# Parameter construction.  Mirrors FullyConnectedSNN.__init__ plus the standard
# set_params() chaining:  layer.set_params(t_min_prev, t_min) -> (t_min, t_min + B_n).
# Note: FullyConnectedSNN passes X_n=1000 into SpikingDense's `name` slot, so the
# effective X_n is the default 1.0 and B_n = 1.5.
# -----------------------------------------------------------------------------
def init_fc_snn_params(key, in_features, layers=2, hidden_units=340,
                       num_classes=10, X_n=1.0):
    B_n = (1.0 + 0.5) * X_n
    num_hidden = layers - 1            # 1 + (layers - 2) SpikingDense(340) layers
    keys = jax.random.split(key, num_hidden + 1)

    t_min_prev, t_min = 0.0, 1.0       # input spike times live in [0, 1]
    fan_in = in_features
    kp = _round_up(in_features, 128)
    in_padded = kp

    hidden = []
    for li in range(num_hidden):
        units = hidden_units
        np_ = _round_up(units, 128)
        t_max = t_min + B_n

        w = (float(fan_in) ** -0.5) * jax.random.normal(
            keys[li], (fan_in, units), jnp.float32)
        d_i = jnp.zeros((np_,), jnp.float32)                       # D_i = 0 (padded)
        w_pad = jnp.zeros((kp, np_), jnp.float32).at[:fan_in, :units].set(w)
        w_bf16 = w_pad.astype(jnp.bfloat16)                        # pad + cast once
        s = t_min * jnp.sum(w_bf16.astype(jnp.float32), axis=0)
        bias = (t_max - d_i - s).reshape(1, np_)                   # folded shift

        hidden.append(dict(W=w_bf16, b=bias, D_i=d_i,
                           t_min=t_min, t_max=t_max))
        t_min_prev, t_min = t_min, t_max
        fan_in, kp = units, np_

    np_out = _round_up(num_classes, 128)
    w = (float(fan_in) ** -0.5) * jax.random.normal(
        keys[-1], (fan_in, num_classes), jnp.float32)
    d_i = jnp.zeros((np_out,), jnp.float32)
    w_pad = jnp.zeros((kp, np_out), jnp.float32).at[:fan_in, :num_classes].set(w)
    w_bf16 = w_pad.astype(jnp.bfloat16)
    s = t_min * jnp.sum(w_bf16.astype(jnp.float32), axis=0)
    out = dict(W=w_bf16, b=(d_i + s).reshape(1, np_out), D_i=d_i,
               t_min=t_min, t_min_prev=t_min_prev)

    return dict(hidden=hidden, out=out, in_padded=in_padded,
                num_classes=num_classes)


# -----------------------------------------------------------------------------
# Forward pass.  Pad the input once, carry bf16 lane-dense activations, slice once.
# -----------------------------------------------------------------------------
def fully_connected_snn_forward(x, params):
    B, F = x.shape
    Mp = _round_up(B, 8)
    Kp = params['in_padded']
    h = jnp.zeros((Mp, Kp), jnp.bfloat16).at[:B, :F].set(x.astype(jnp.bfloat16))

    for layer in params['hidden']:
        h = spiking_dense(h, layer['W'], layer['b'], t_max=layer['t_max'],
                          output_layer=False, out_dtype=jnp.bfloat16)

    o = params['out']
    out = spiking_dense(h, o['W'], o['b'], t_max=0.0,
                        output_layer=True, out_dtype=jnp.float32)
    return out[:B, :params['num_classes']]


# -----------------------------------------------------------------------------
# Pure-JAX f32 reference using the original call_spiking formulation (same
# bf16-quantized weights) for a correctness check.
# -----------------------------------------------------------------------------
def reference_forward(x, params):
    B, F = x.shape
    h = jnp.zeros((B, params['in_padded']), jnp.float32).at[:, :F].set(
        x.astype(jnp.float32))
    hi = jax.lax.Precision.HIGHEST
    for layer in params['hidden']:
        W = layer['W'].astype(jnp.float32)
        t_min, t_max, D_i = layer['t_min'], layer['t_max'], layer['D_i']
        threshold = t_max - t_min - D_i
        ti = jnp.matmul(h - t_min, W, precision=hi) + threshold + t_min
        h = jnp.where(ti < t_max, ti, t_max)
    o = params['out']
    W = o['W'].astype(jnp.float32)
    alpha = o['D_i'] / (o['t_min'] - o['t_min_prev'])
    out = alpha * (o['t_min'] - o['t_min_prev']) + jnp.matmul(
        o['t_min'] - h, W, precision=hi)
    return out[:, :params['num_classes']]


if __name__ == "__main__":
    key = jax.random.PRNGKey(0)
    k_x, k_p = jax.random.split(key)

    batch, in_features = 2, 64
    # Input spike times lie in [t_min_prev, t_min] = [0, 1].
    x = jax.random.uniform(k_x, (batch, in_features), dtype=jnp.float32)

    # layers=3 -> two hidden SpikingDense(340) layers + SpikingDense(10, outputLayer).
    params = init_fc_snn_params(k_p, in_features=in_features, layers=3,
                                hidden_units=340, num_classes=10, X_n=1.0)

    fwd = jax.jit(lambda xx: fully_connected_snn_forward(xx, params))
    out = jax.block_until_ready(fwd(x))

    assert out.shape == (batch, 10), out.shape
    assert bool(jnp.all(jnp.isfinite(out)))

    ref = reference_forward(x, params)
    assert bool(jnp.allclose(out, ref, atol=1e-1, rtol=1e-2)), (
        float(jnp.max(jnp.abs(out - ref))))

    print("KERNEL_OK")
</pallas_src>

<mosaic_0001>
module attributes {stable_mosaic.version = 11 : i64} {
  func.func @_spiking_dense_kernel(%arg0: i32, %arg1: i32, %arg2: memref<8x128xbf16, #tpu.memory_space<vmem>>, %arg3: memref<128x384xbf16, #tpu.memory_space<vmem>>, %arg4: memref<1x384xf32, #tpu.memory_space<vmem>>, %arg5: memref<8x384xbf16, #tpu.memory_space<vmem>>) attributes {dimension_semantics = [#tpu.dimension_semantics<parallel>, #tpu.dimension_semantics<parallel>], iteration_bounds = array<i64: 1, 1>, scalar_prefetch = 0 : i64, scratch_operands = 0 : i64, tpu.core_type = #tpu.core_type<tc>, window_params = [{transform_indices = @transform_0, window_bounds = array<i64: 8, 128>}, {transform_indices = @transform_1, window_bounds = array<i64: 128, 384>}, {transform_indices = @transform_2, window_bounds = array<i64: 1, 384>}, {transform_indices = @transform_3, window_bounds = array<i64: 8, 384>}]} {
    %c0 = arith.constant 0 : index
    %c0_0 = arith.constant 0 : index
    %0 = vector.load %arg2[%c0, %c0_0] : memref<8x128xbf16, #tpu.memory_space<vmem>>, vector<8x128xbf16>
    %c0_1 = arith.constant 0 : index
    %c0_2 = arith.constant 0 : index
    %1 = vector.load %arg3[%c0_1, %c0_2] : memref<128x384xbf16, #tpu.memory_space<vmem>>, vector<128x384xbf16>
    %cst = arith.constant dense<0.000000e+00> : vector<8x384xf32>
    %2 = tpu.matmul %0, %1, %cst {dimension_numbers = #tpu.dot_dimension_numbers<[1], [0], [0], [1], [0, 0, 1, 1], [], []>} : vector<8x128xbf16>, vector<128x384xbf16>, vector<8x384xf32> -> vector<8x384xf32>
    %c0_3 = arith.constant 0 : index
    %c0_4 = arith.constant 0 : index
    %3 = vector.load %arg4[%c0_3, %c0_4] : memref<1x384xf32, #tpu.memory_space<vmem>>, vector<1x384xf32>
    %4 = vector.broadcast %3 : vector<1x384xf32> to vector<8x384xf32>
    %5 = arith.addf %2, %4 : vector<8x384xf32>
    %cst_5 = arith.constant 2.500000e+00 : f32
    %6 = vector.broadcast %cst_5 : f32 to vector<8x384xf32>
    %7 = arith.minimumf %5, %6 : vector<8x384xf32>
    %8 = arith.truncf %7 : vector<8x384xf32> to vector<8x384xbf16>
    %c0_6 = arith.constant 0 : index
    %c0_7 = arith.constant 0 : index
    %9 = vector.load %arg5[%c0_6, %c0_7] : memref<8x384xbf16, #tpu.memory_space<vmem>>, vector<8x384xbf16>
    tpu.vector_store %arg5[%c0_6, %c0_7], %8 {strides = array<i32>} : memref<8x384xbf16, #tpu.memory_space<vmem>>, vector<8x384xbf16>,
    return
  }
  func.func @transform_0(%arg0: i32, %arg1: i32) -> (i32, i32) {
    %c0_i32 = arith.constant 0 : i32
    %c0_i32_0 = arith.constant 0 : i32
    return %arg0, %c0_i32 : i32, i32
  }
  func.func @transform_1(%arg0: i32, %arg1: i32) -> (i32, i32) {
    %c0_i32 = arith.constant 0 : i32
    %c0_i32_0 = arith.constant 0 : i32
    return %c0_i32, %arg1 : i32, i32
  }
  func.func @transform_2(%arg0: i32, %arg1: i32) -> (i32, i32) {
    %c0_i32 = arith.constant 0 : i32
    %c0_i32_0 = arith.constant 0 : i32
    return %c0_i32, %arg1 : i32, i32
  }
  func.func @transform_3(%arg0: i32, %arg1: i32) -> (i32, i32) {
    %c0_i32 = arith.constant 0 : i32
    return %arg0, %arg1 : i32, i32
  }
}

module attributes {stable_mosaic.version = 11 : i64} {
  func.func @_spiking_dense_kernel(%arg0: i32, %arg1: i32, %arg2: memref<8x384xbf16, #tpu.memory_space<vmem>>, %arg3: memref<384x128xbf16, #tpu.memory_space<vmem>>, %arg4: memref<1x128xf32, #tpu.memory_space<vmem>>, %arg5: memref<8x128xf32, #tpu.memory_space<vmem>>) attributes {dimension_semantics = [#tpu.dimension_semantics<parallel>, #tpu.dimension_semantics<parallel>], iteration_bounds = array<i64: 1, 1>, scalar_prefetch = 0 : i64, scratch_operands = 0 : i64, tpu.core_type = #tpu.core_type<tc>, window_params = [{transform_indices = @transform_0, window_bounds = array<i64: 8, 384>}, {transform_indices = @transform_1, window_bounds = array<i64: 384, 128>}, {transform_indices = @transform_2, window_bounds = array<i64: 1, 128>}, {transform_indices = @transform_3, window_bounds = array<i64: 8, 128>}]} {
    %c0 = arith.constant 0 : index
    %c0_0 = arith.constant 0 : index
    %0 = vector.load %arg2[%c0, %c0_0] : memref<8x384xbf16, #tpu.memory_space<vmem>>, vector<8x384xbf16>
    %c0_1 = arith.constant 0 : index
    %c0_2 = arith.constant 0 : index
    %1 = vector.load %arg3[%c0_1, %c0_2] : memref<384x128xbf16, #tpu.memory_space<vmem>>, vector<384x128xbf16>
    %cst = arith.constant dense<0.000000e+00> : vector<8x128xf32>
    %2 = tpu.matmul %0, %1, %cst {dimension_numbers = #tpu.dot_dimension_numbers<[1], [0], [0], [1], [0, 0, 1, 1], [], []>} : vector<8x384xbf16>, vector<384x128xbf16>, vector<8x128xf32> -> vector<8x128xf32>
    %c0_3 = arith.constant 0 : index
    %c0_4 = arith.constant 0 : index
    %3 = vector.load %arg4[%c0_3, %c0_4] : memref<1x128xf32, #tpu.memory_space<vmem>>, vector<1x128xf32>
    %4 = vector.broadcast %3 : vector<1x128xf32> to vector<8x128xf32>
    %5 = arith.subf %4, %2 : vector<8x128xf32>
    %c0_5 = arith.constant 0 : index
    %c0_6 = arith.constant 0 : index
    %6 = vector.load %arg5[%c0_5, %c0_6] : memref<8x128xf32, #tpu.memory_space<vmem>>, vector<8x128xf32>
    tpu.vector_store %arg5[%c0_5, %c0_6], %5 {strides = array<i32>} : memref<8x128xf32, #tpu.memory_space<vmem>>, vector<8x128xf32>,
    return
  }
  func.func @transform_0(%arg0: i32, %arg1: i32) -> (i32, i32) {
    %c0_i32 = arith.constant 0 : i32
    %c0_i32_0 = arith.constant 0 : i32
    return %arg0, %c0_i32 : i32, i32
  }
  func.func @transform_1(%arg0: i32, %arg1: i32) -> (i32, i32) {
    %c0_i32 = arith.constant 0 : i32
    %c0_i32_0 = arith.constant 0 : i32
    return %c0_i32, %arg1 : i32, i32
  }
  func.func @transform_2(%arg0: i32, %arg1: i32) -> (i32, i32) {
    %c0_i32 = arith.constant 0 : i32
    %c0_i32_0 = arith.constant 0 : i32
    return %c0_i32, %arg1 : i32, i32
  }
  func.func @transform_3(%arg0: i32, %arg1: i32) -> (i32, i32) {
    %c0_i32 = arith.constant 0 : i32
    return %arg0, %arg1 : i32, i32
  }
}

module attributes {stable_mosaic.version = 11 : i64} {
  func.func @_spiking_dense_kernel(%arg0: i32, %arg1: i32, %arg2: memref<8x384xbf16, #tpu.memory_space<vmem>>, %arg3: memref<384x384xbf16, #tpu.memory_space<vmem>>, %arg4: memref<1x384xf32, #tpu.memory_space<vmem>>, %arg5: memref<8x384xbf16, #tpu.memory_space<vmem>>) attributes {dimension_semantics = [#tpu.dimension_semantics<parallel>, #tpu.dimension_semantics<parallel>], iteration_bounds = array<i64: 1, 1>, scalar_prefetch = 0 : i64, scratch_operands = 0 : i64, tpu.core_type = #tpu.core_type<tc>, window_params = [{transform_indices = @transform_0, window_bounds = array<i64: 8, 384>}, {transform_indices = @transform_1, window_bounds = array<i64: 384, 384>}, {transform_indices = @transform_2, window_bounds = array<i64: 1, 384>}, {transform_indices = @transform_3, window_bounds = array<i64: 8, 384>}]} {
    %c0 = arith.constant 0 : index
    %c0_0 = arith.constant 0 : index
    %0 = vector.load %arg2[%c0, %c0_0] : memref<8x384xbf16, #tpu.memory_space<vmem>>, vector<8x384xbf16>
    %c0_1 = arith.constant 0 : index
    %c0_2 = arith.constant 0 : index
    %1 = vector.load %arg3[%c0_1, %c0_2] : memref<384x384xbf16, #tpu.memory_space<vmem>>, vector<384x384xbf16>
    %cst = arith.constant dense<0.000000e+00> : vector<8x384xf32>
    %2 = tpu.matmul %0, %1, %cst {dimension_numbers = #tpu.dot_dimension_numbers<[1], [0], [0], [1], [0, 0, 1, 1], [], []>} : vector<8x384xbf16>, vector<384x384xbf16>, vector<8x384xf32> -> vector<8x384xf32>
    %c0_3 = arith.constant 0 : index
    %c0_4 = arith.constant 0 : index
    %3 = vector.load %arg4[%c0_3, %c0_4] : memref<1x384xf32, #tpu.memory_space<vmem>>, vector<1x384xf32>
    %4 = vector.broadcast %3 : vector<1x384xf32> to vector<8x384xf32>
    %5 = arith.addf %2, %4 : vector<8x384xf32>
    %cst_5 = arith.constant 4.000000e+00 : f32
    %6 = vector.broadcast %cst_5 : f32 to vector<8x384xf32>
    %7 = arith.minimumf %5, %6 : vector<8x384xf32>
    %8 = arith.truncf %7 : vector<8x384xf32> to vector<8x384xbf16>
    %c0_6 = arith.constant 0 : index
    %c0_7 = arith.constant 0 : index
    %9 = vector.load %arg5[%c0_6, %c0_7] : memref<8x384xbf16, #tpu.memory_space<vmem>>, vector<8x384xbf16>
    tpu.vector_store %arg5[%c0_6, %c0_7], %8 {strides = array<i32>} : memref<8x384xbf16, #tpu.memory_space<vmem>>, vector<8x384xbf16>,
    return
  }
  func.func @transform_0(%arg0: i32, %arg1: i32) -> (i32, i32) {
    %c0_i32 = arith.constant 0 : i32
    %c0_i32_0 = arith.constant 0 : i32
    return %arg0, %c0_i32 : i32, i32
  }
  func.func @transform_1(%arg0: i32, %arg1: i32) -> (i32, i32) {
    %c0_i32 = arith.constant 0 : i32
    %c0_i32_0 = arith.constant 0 : i32
    return %c0_i32, %arg1 : i32, i32
  }
  func.func @transform_2(%arg0: i32, %arg1: i32) -> (i32, i32) {
    %c0_i32 = arith.constant 0 : i32
    %c0_i32_0 = arith.constant 0 : i32
    return %c0_i32, %arg1 : i32, i32
  }
  func.func @transform_3(%arg0: i32, %arg1: i32) -> (i32, i32) {
    %c0_i32 = arith.constant 0 : i32
    return %arg0, %arg1 : i32, i32
  }
}

</mosaic_0001>

<bundles_post_ra>
// kernel: _lambda_.3
= control target key start
LH: loop header
LB: loop body
LE: loop exit
PB: predicated region body
PF: predicated region fallthrough
CT: control target
= control target key end

     0   :  { %v388_v0 = vmov 0.0   ;;  %vm389_vm0 = vmmov 0   ;;  %v390_v3 = vmov 0   ;;  %v50_v27 = vlaneseq  ;;  %s495_s1 = inlined_call_operand.vmem [shape: bf16[128,384], index: 1, kind: input, shape index: {}]   ;;  %s496_s0 = inlined_call_operand.vmem [shape: bf16[8,128], index: 0, kind: input, shape index: {}]   ;;  %s497_s2 = inlined_call_operand.vmem [shape: f32[1,384], index: 2, kind: input, shape index: {}]   ;;  %s498_s3 = inlined_call_operand.vmem [shape: bf16[8,384], index: 3, kind: output, shape index: {}]  }
   0x1   :  { %333 = vmatprep.subr.bf16.mxu1 %v388_v0  ;;  %v356_v1 = vld [vmem:[%s495_s1 + $0x4] ss:$12 sps:$4 sm:$0xff]   ;;  %349 = vmatprep.mubr.msk.bf16.mxu1 %vm389_vm0, %v388_v0  ;;  %v358_v2 = vld [vmem:[%s495_s1 + $0x8] ss:$12 sps:$4 sm:$0xff]   ;;  %v359_v4 = vld [vmem:[%s495_s1] ss:$12 sps:$4 sm:$0xff]  }
   0x2   :  { %225 = vmatprep.mubr.bf16.mxu0 %v390_v3  ;;  %193 = vmatprep.subr.bf16.mxu0 %v356_v1  ;;  %v360_v5 = vld [vmem:[%s495_s1 + $0x1c] ss:$12 sps:$4 sm:$0xff]   ;;  %v362_v6 = vld [vmem:[%s495_s1 + $0x20] ss:$12 sps:$4 sm:$0xff]   ;;  %v363_v7 = vld [vmem:[%s495_s1 + $0x18] ss:$12 sps:$4 sm:$0xff]  }
   0x3   :  { %334 = vmatpush3.bf16.msra.mxu1 %v358_v2  ;;  %194 = vmatpush1.bf16.msra.mxu0 %v359_v4  ;;  %v364_v8 = vld [vmem:[%s495_s1 + $0x34] ss:$12 sps:$4 sm:$0xff]   ;;  %v366_v9 = vld [vmem:[%s495_s1 + $0x38] ss:$12 sps:$4 sm:$0xff]   ;;  %v367_v10 = vld [vmem:[%s495_s1 + $0x30] ss:$12 sps:$4 sm:$0xff]  }
   0x4   :  { %335 = vmatprep.subr.bf16.mxu1 %v388_v0  ;;  %195 = vmatprep.subr.bf16.mxu0 %v360_v5  ;;  %v368_v11 = vld [vmem:[%s495_s1 + $0x4c] ss:$12 sps:$4 sm:$0xff]   ;;  %v370_v12 = vld [vmem:[%s495_s1 + $0x50] ss:$12 sps:$4 sm:$0xff]   ;;  %v371_v13 = vld [vmem:[%s495_s1 + $0x48] ss:$12 sps:$4 sm:$0xff]  }
   0x5   :  { %v372_v14 = vld [vmem:[%s495_s1 + $0x64] ss:$12 sps:$4 sm:$0xff]   ;;  %v374_v15 = vld [vmem:[%s495_s1 + $0x68] ss:$12 sps:$4 sm:$0xff]   ;;  %v375_v16 = vld [vmem:[%s495_s1 + $0x60] ss:$12 sps:$4 sm:$0xff]  }
   0x6   :  { %v376_v17 = vld [vmem:[%s495_s1 + $0x7c] ss:$12 sps:$4 sm:$0xff]   ;;  %v378_v18 = vld [vmem:[%s495_s1 + $0x80] ss:$12 sps:$4 sm:$0xff]   ;;  %v379_v19 = vld [vmem:[%s495_s1 + $0x78] ss:$12 sps:$4 sm:$0xff]  }
   0x7   :  { %336 = vmatpush3.bf16.msra.mxu1 %v362_v6  ;;  %196 = vmatpush1.bf16.msra.mxu0 %v363_v7  ;;  %v380_v20 = vld [vmem:[%s495_s1 + $0x94] ss:$12 sps:$4 sm:$0xff]   ;;  %v382_v21 = vld [vmem:[%s495_s1 + $0x98] ss:$12 sps:$4 sm:$0xff]   ;;  %v383_v22 = vld [vmem:[%s495_s1 + $0x90] ss:$12 sps:$4 sm:$0xff]  }
   0x8   :  { %337 = vmatprep.subr.bf16.mxu1 %v388_v0  ;;  %197 = vmatprep.subr.bf16.mxu0 %v364_v8  ;;  %v384_v23 = vld [vmem:[%s495_s1 + $0xac] ss:$12 sps:$4 sm:$0xff]   ;;  %v386_v24 = vld [vmem:[%s495_s1 + $0xb0] ss:$12 sps:$4 sm:$0xff]   ;;  %v387_v25 = vld [vmem:[%s495_s1 + $0xa8] ss:$12 sps:$4 sm:$0xff]  }
   0x9   :  { %v15_v26 = vld [vmem:[%s496_s0] sm:$0xf]  ;;  %v51_v28 = vshrl.u32 %v50_v27, 7 }
   0xa   :  { %v48_v30 = vld [vmem:[%s497_s2] sm:$0x7] }
   0xb   :  { %338 = vmatpush3.bf16.msra.mxu1 %v366_v9  ;;  %198 = vmatpush1.bf16.msra.mxu0 %v367_v10  ;;  %v60_v29 = vsub.s32 2, %v51_v28  ;;  %v52_v31 = vsub.s32 0, %v51_v28  ;;  %v56_v32 = vsub.s32 1, %v51_v28 }
   0xc   :  { %339 = vmatprep.subr.bf16.mxu1 %v388_v0  ;;  %199 = vmatprep.subr.bf16.mxu0 %v368_v11 }
   0xd   :  { %v61_v33 = vrot.slane %v48_v30, %v60_v29  ;;  %v53_v34 = vrot.slane %v48_v30, %v52_v31  ;;  %v57_v35 = vrot.slane %v48_v30, %v56_v32 }
   0xf   :  { %340 = vmatpush3.bf16.msra.mxu1 %v370_v12  ;;  %200 = vmatpush1.bf16.msra.mxu0 %v371_v13 }
  0x10   :  { %341 = vmatprep.subr.bf16.mxu1 %v388_v0  ;;  %201 = vmatprep.subr.bf16.mxu0 %v372_v14 }
  0x13   :  { %342 = vmatpush3.bf16.msra.mxu1 %v374_v15  ;;  %202 = vmatpush1.bf16.msra.mxu0 %v375_v16 }
  0x14   :  { %343 = vmatprep.subr.bf16.mxu1 %v388_v0  ;;  %203 = vmatprep.subr.bf16.mxu0 %v376_v17 }
  0x17   :  { %344 = vmatpush3.bf16.msra.mxu1 %v378_v18  ;;  %204 = vmatpush1.bf16.msra.mxu0 %v379_v19 }
  0x18   :  { %345 = vmatprep.subr.bf16.mxu1 %v388_v0  ;;  %205 = vmatprep.subr.bf16.mxu0 %v380_v20 }
  0x1b   :  { %346 = vmatpush3.bf16.msra.mxu1 %v382_v21  ;;  %206 = vmatpush1.bf16.msra.mxu0 %v383_v22 }
  0x1c   :  { %347 = vmatprep.subr.bf16.mxu1 %v388_v0  ;;  %207 = vmatprep.subr.bf16.mxu0 %v384_v23 }
  0x1f   :  { %348 = vmatpush3.bf16.msra.mxu1 %v386_v24  ;;  %208 = vmatpush1.bf16.msra.mxu0 %v387_v25 }
  0x22   :  { %350 = vmatmul.mubr.bf16.vlgmr.msra.gmra.mrb[0].mxu1 %v15_v26  ;;  %226 = vmatmul.mubr.bf16.vlgmr.msra.gmra.mrb[0].mxu0 %v15_v26 }
  0xf5   :  { %v268_v36 = vpop.f32.mrb[0].mxu1  ;;  %v227_v38 = vpop.f32.mrb[0].mxu0 }
  0xf6   :  { %v269_v37 = vadd.f32 %v268_v36, %v61_v33  ;;  %v351_v39 = vpop.f32.mrb[1].mxu1  ;;  %v228_v40 = vadd.f32 %v227_v38, %v53_v34  ;;  %v229_v41 = vpop.f32.mrb[1].mxu0 }
  0xf7   :  { %v271_v42 = vpop.f32.mrb[2].mxu1  ;;  %v230_v44 = vadd.f32 %v229_v41, %v57_v35  ;;  %v231_v45 = vpop.f32.mrb[2].mxu0 }
  0xf8   :  { %v276_v43 = vmin.f32 %v269_v37, 2.5  ;;  %v352_v46 = vpop.f32.mrb[3].mxu1  ;;  %v274_v47 = vmin.f32 %v228_v40, 2.5  ;;  %v232_v48 = vpop.f32.mrb[3].mxu0 }
  0xf9   :  { %v275_v50 = vmin.f32 %v230_v44, 2.5 }
  0xfa   :  { %v323_v49 = vpack.c.bf16 %v276_v43, %v276_v43 }
  0xfb   :  { %v322_v51 = vpack.c.bf16 %v275_v50, %v274_v47 }
  0xfc   :  { %291 = vst [vmem:[%s498_s3 + $0x8] sm:$0xf] %v323_v49 }
  0xfd   :  { %290 = vst [vmem:[%s498_s3] sm:$0xff] %v322_v51 }

// kernel: _lambda_.5
= control target key start
LH: loop header
LB: loop body
LE: loop exit
PB: predicated region body
PF: predicated region fallthrough
CT: control target
= control target key end

     0   :  { %v421_v1 = vmov 0.0   ;;  %vm422_vm0 = vmmov 0   ;;  %s527_s1 = inlined_call_operand.vmem [shape: bf16[384,128], index: 1, kind: input, shape index: {}]   ;;  %s528_s0 = inlined_call_operand.vmem [shape: bf16[8,384], index: 0, kind: input, shape index: {}]   ;;  %s529_s2 = inlined_call_operand.vmem [shape: f32[1,128], index: 2, kind: input, shape index: {}]   ;;  %s530_s3 = inlined_call_operand.vmem [shape: f32[8,128], index: 3, kind: output, shape index: {}]  }
   0x1   :  { %v394_v0 = vld [vmem:[%s527_s1 + $0x40] sm:$0xff]   ;;  %372 = vmatprep.subr.bf16.mxu1 %v421_v1  ;;  %388 = vmatprep.mubr.msk.bf16.mxu1 %vm422_vm0, %v421_v1  ;;  %v397_v4 = vld [vmem:[%s527_s1 + $0x48] sm:$0xff]   ;;  %v400_v7 = vld [vmem:[%s527_s1 + $0x50] sm:$0xff]  }
   0x2   :  { %v395_v2 = vld [vmem:[%s527_s1] sm:$0xff]   ;;  %341 = vmatprep.subr.bf16.mxu0 %v394_v0  ;;  %v398_v5 = vld [vmem:[%s527_s1 + $0x8] sm:$0xff]   ;;  %v401_v8 = vld [vmem:[%s527_s1 + $0x10] sm:$0xff]  }
   0x3   :  { %v396_v3 = vld [vmem:[%s527_s1 + $0x80] sm:$0xff]   ;;  %342 = vmatpush3.bf16.msra.mxu0 %v395_v2  ;;  %v399_v6 = vld [vmem:[%s527_s1 + $0x88] sm:$0xff]   ;;  %v402_v9 = vld [vmem:[%s527_s1 + $0x90] sm:$0xff]  }
   0x4   :  { %373 = vmatpush3.bf16.msra.mxu1 %v396_v3  ;;  %343 = vmatprep.subr.bf16.mxu0 %v397_v4  ;;  %v403_v10 = vld [vmem:[%s527_s1 + $0x58] sm:$0xff]   ;;  %v406_v13 = vld [vmem:[%s527_s1 + $0x60] sm:$0xff]   ;;  %v409_v16 = vld [vmem:[%s527_s1 + $0x68] sm:$0xff]  }
   0x5   :  { %374 = vmatprep.subr.bf16.mxu1 %v421_v1  ;;  %v404_v11 = vld [vmem:[%s527_s1 + $0x18] sm:$0xff]   ;;  %v407_v14 = vld [vmem:[%s527_s1 + $0x20] sm:$0xff]   ;;  %v410_v17 = vld [vmem:[%s527_s1 + $0x28] sm:$0xff]  }
   0x6   :  { %v405_v12 = vld [vmem:[%s527_s1 + $0x98] sm:$0xff]   ;;  %v408_v15 = vld [vmem:[%s527_s1 + $0xa0] sm:$0xff]   ;;  %v411_v18 = vld [vmem:[%s527_s1 + $0xa8] sm:$0xff]  }
   0x7   :  { %344 = vmatpush3.bf16.msra.mxu0 %v398_v5  ;;  %v412_v19 = vld [vmem:[%s527_s1 + $0x70] sm:$0xff]   ;;  %v415_v22 = vld [vmem:[%s527_s1 + $0x78] sm:$0xff]   ;;  %v15_v23 = vld [vmem:[%s528_s0] sm:$0xff] }
   0x8   :  { %375 = vmatpush3.bf16.msra.mxu1 %v399_v6  ;;  %345 = vmatprep.subr.bf16.mxu0 %v400_v7  ;;  %v413_v20 = vld [vmem:[%s527_s1 + $0x30] sm:$0xff]   ;;  %v314_v24 = vcombine.high %v15_v23, %v15_v23  ;;  %v416_v25 = vld [vmem:[%s527_s1 + $0x38] sm:$0xff]   ;;  %v313_v27 = vcombine.low %v15_v23, %v15_v23  ;;  %v420_v28 = vld [vmem:[%s528_s0 + $0x8] ss:$0 sps:$4 sm:$0xff]  }
   0x9   :  { %376 = vmatprep.subr.bf16.mxu1 %v421_v1  ;;  %v414_v21 = vld [vmem:[%s527_s1 + $0xb0] sm:$0xff]   ;;  %v417_v26 = vld [vmem:[%s527_s1 + $0xb8] sm:$0xff]   ;;  %v340_v35 = vld [vmem:[%s529_s2] ss:$0 sm:$0xff] }
   0xa   :  { %252 = vmatprep.mubr.bf16.mxu0 %v314_v24 }
   0xb   :  { %346 = vmatpush3.bf16.msra.mxu0 %v401_v8 }
   0xc   :  { %377 = vmatpush3.bf16.msra.mxu1 %v402_v9  ;;  %347 = vmatprep.subr.bf16.mxu0 %v403_v10 }
   0xd   :  { %378 = vmatprep.subr.bf16.mxu1 %v421_v1 }
   0xf   :  { %348 = vmatpush3.bf16.msra.mxu0 %v404_v11 }
  0x10   :  { %379 = vmatpush3.bf16.msra.mxu1 %v405_v12  ;;  %349 = vmatprep.subr.bf16.mxu0 %v406_v13 }
  0x11   :  { %380 = vmatprep.subr.bf16.mxu1 %v421_v1 }
  0x13   :  { %350 = vmatpush3.bf16.msra.mxu0 %v407_v14 }
  0x14   :  { %381 = vmatpush3.bf16.msra.mxu1 %v408_v15  ;;  %351 = vmatprep.subr.bf16.mxu0 %v409_v16 }
  0x15   :  { %382 = vmatprep.subr.bf16.mxu1 %v421_v1 }
  0x17   :  { %352 = vmatpush3.bf16.msra.mxu0 %v410_v17 }
  0x18   :  { %383 = vmatpush3.bf16.msra.mxu1 %v411_v18  ;;  %353 = vmatprep.subr.bf16.mxu0 %v412_v19 }
  0x19   :  { %384 = vmatprep.subr.bf16.mxu1 %v421_v1 }
  0x1b   :  { %354 = vmatpush3.bf16.msra.mxu0 %v413_v20 }
  0x1c   :  { %385 = vmatpush3.bf16.msra.mxu1 %v414_v21  ;;  %355 = vmatprep.subr.bf16.mxu0 %v415_v22 }
  0x1d   :  { %386 = vmatprep.subr.bf16.mxu1 %v421_v1 }
  0x1f   :  { %356 = vmatpush3.bf16.msra.mxu0 %v416_v25 }
  0x20   :  { %387 = vmatpush3.bf16.msra.mxu1 %v417_v26 }
  0x22   :  { %253 = vmatmul.mubr.bf16.vlgmr.msra.gmra.mrb[0].mxu0 %v313_v27 }
  0x23   :  { %389 = vmatmul.mubr.bf16.vlgmr.msra.gmra.mrb[0].mxu1 %v420_v28 }
  0xf5   :  { %v357_v29 = vpop.f32.mrb[0].mxu0 }
  0xf6   :  { %v294_v30 = vpop.f32.mrb[0].mxu1  ;;  %v358_v31 = vpop.f32.mrb[1].mxu0 }
  0xf7   :  { %v359_v32 = vadd.f32 %v358_v31, %v357_v29  ;;  %v390_v33 = vpop.f32.mrb[1].mxu1  ;;  %v360_v34 = vpop.f32.mrb[2].mxu0 }
  0xf8   :  { %v297_v36 = vpop.f32.mrb[2].mxu1  ;;  %v361_v37 = vpop.f32.mrb[3].mxu0 }
  0xf9   :  { %v295_v38 = vadd.f32 %v359_v32, %v294_v30  ;;  %v391_v39 = vpop.f32.mrb[3].mxu1 }
  0xfb   :  { %v307_v40 = vsub.f32 %v340_v35, %v295_v38 }
  0xfd   :  { %308 = vst [vmem:[%s530_s3] sm:$0xff] %v307_v40 }

// kernel: _lambda_.4
= control target key start
LH: loop header
LB: loop body
LE: loop exit
PB: predicated region body
PF: predicated region fallthrough
CT: control target
= control target key end

     0   :  { %v947_v40 = vmov 0.0   ;;  %vm948_vm0 = vmmov 0   ;;  %s1201_s1 = inlined_call_operand.vmem [shape: bf16[384,384], index: 1, kind: input, shape index: {}]   ;;  %s1202_s0 = inlined_call_operand.vmem [shape: bf16[8,384], index: 0, kind: input, shape index: {}]   ;;  %s1203_s2 = inlined_call_operand.vmem [shape: f32[1,384], index: 2, kind: input, shape index: {}]   ;;  %s1204_s3 = inlined_call_operand.vmem [shape: bf16[8,384], index: 3, kind: output, shape index: {}]  }
   0x1   :  { %v848_v0 = vld [vmem:[%s1201_s1 + $0x4] ss:$12 sps:$4 sm:$0xff]   ;;  %v850_v1 = vld [vmem:[%s1201_s1] ss:$12 sps:$4 sm:$0xff]   ;;  %v851_v2 = vld [vmem:[%s1201_s1 + $0x1c] ss:$12 sps:$4 sm:$0xff]  }
   0x2   :  { %525 = vmatprep.subr.bf16.mxu0 %v848_v0  ;;  %v853_v3 = vld [vmem:[%s1201_s1 + $0x18] ss:$12 sps:$4 sm:$0xff]   ;;  %v854_v4 = vld [vmem:[%s1201_s1 + $0xc8] ss:$12 sps:$4 sm:$0xff]   ;;  %v858_v7 = vld [vmem:[%s1201_s1 + $0x30] ss:$12 sps:$4 sm:$0xff]  }
   0x3   :  { %526 = vmatpush1.bf16.msra.mxu0 %v850_v1  ;;  %v855_v5 = vld [vmem:[%s1201_s1 + $0x8] ss:$12 sps:$4 sm:$0xff]   ;;  %788 = vmatprep.subr.bf16.mxu1 %v854_v4  ;;  %v859_v8 = vld [vmem:[%s1201_s1 + $0xe0] ss:$12 sps:$4 sm:$0xff]   ;;  %v864_v12 = vld [vmem:[%s1201_s1 + $0xf8] ss:$12 sps:$4 sm:$0xff]  }
   0x4   :  { %527 = vmatprep.subr.bf16.mxu0 %v851_v2  ;;  %v856_v6 = vld [vmem:[%s1201_s1 + $0x34] ss:$12 sps:$4 sm:$0xff]   ;;  %789 = vmatpush3.bf16.msra.mxu1 %v855_v5  ;;  %v861_v10 = vld [vmem:[%s1201_s1 + $0x4c] ss:$12 sps:$4 sm:$0xff]   ;;  %v866_v14 = vld [vmem:[%s1201_s1 + $0x64] ss:$12 sps:$4 sm:$0xff]  }
   0x5   :  { %v860_v9 = vld [vmem:[%s1201_s1 + $0x20] ss:$12 sps:$4 sm:$0xff]   ;;  %790 = vmatprep.subr.bf16.mxu1 %v859_v8  ;;  %v863_v11 = vld [vmem:[%s1201_s1 + $0x48] ss:$12 sps:$4 sm:$0xff]   ;;  %v865_v13 = vld [vmem:[%s1201_s1 + $0x38] ss:$12 sps:$4 sm:$0xff]  }
   0x6   :  { %v869_v15 = vld [vmem:[%s1201_s1 + $0x110] ss:$12 sps:$4 sm:$0xff]   ;;  %v868_v17 = vld [vmem:[%s1201_s1 + $0x60] ss:$12 sps:$4 sm:$0xff]   ;;  %v874_v19 = vld [vmem:[%s1201_s1 + $0x128] ss:$12 sps:$4 sm:$0xff]  }
   0x7   :  { %528 = vmatpush1.bf16.msra.mxu0 %v853_v3  ;;  %v870_v16 = vld [vmem:[%s1201_s1 + $0x50] ss:$12 sps:$4 sm:$0xff]   ;;  %v873_v20 = vld [vmem:[%s1201_s1 + $0x78] ss:$12 sps:$4 sm:$0xff]   ;;  %v875_v21 = vld [vmem:[%s1201_s1 + $0x68] ss:$12 sps:$4 sm:$0xff]  }
   0x8   :  { %529 = vmatprep.subr.bf16.mxu0 %v856_v6  ;;  %791 = vmatpush3.bf16.msra.mxu1 %v860_v9  ;;  %v871_v18 = vld [vmem:[%s1201_s1 + $0x7c] ss:$12 sps:$4 sm:$0xff]   ;;  %v876_v22 = vld [vmem:[%s1201_s1 + $0x94] ss:$12 sps:$4 sm:$0xff]   ;;  %v884_v26 = vld [vmem:[%s1201_s1 + $0x158] ss:$12 sps:$4 sm:$0xff]  }
   0x9   :  { %792 = vmatprep.subr.bf16.mxu1 %v864_v12  ;;  %v879_v23 = vld [vmem:[%s1201_s1 + $0x140] ss:$12 sps:$4 sm:$0xff]   ;;  %v878_v24 = vld [vmem:[%s1201_s1 + $0x90] ss:$12 sps:$4 sm:$0xff]   ;;  %v883_v28 = vld [vmem:[%s1201_s1 + $0xa8] ss:$12 sps:$4 sm:$0xff]  }
   0xa   :  { %v880_v25 = vld [vmem:[%s1201_s1 + $0x80] ss:$12 sps:$4 sm:$0xff]   ;;  %v885_v29 = vld [vmem:[%s1201_s1 + $0x98] ss:$12 sps:$4 sm:$0xff]   ;;  %v889_v30 = vld [vmem:[%s1201_s1 + $0x170] ss:$12 sps:$4 sm:$0xff]  }
   0xb   :  { %530 = vmatpush1.bf16.msra.mxu0 %v858_v7  ;;  %v881_v27 = vld [vmem:[%s1201_s1 + $0xac] ss:$12 sps:$4 sm:$0xff]   ;;  %v886_v31 = vld [vmem:[%s1201_s1 + $0xc4] ss:$12 sps:$4 sm:$0xff]   ;;  %v891_v36 = vld [vmem:[%s1201_s1 + $0xdc] ss:$12 sps:$4 sm:$0xff]  }
   0xc   :  { %531 = vmatprep.subr.bf16.mxu0 %v861_v10  ;;  %793 = vmatpush3.bf16.msra.mxu1 %v865_v13  ;;  %v15_v32 = vld [vmem:[%s1202_s0] sm:$0xff]  ;;  %v890_v33 = vld [vmem:[%s1201_s1 + $0xb0] ss:$12 sps:$4 sm:$0xff]   ;;  %v897_v38 = vld [vmem:[%s1201_s1 + $0x188] ss:$12 sps:$4 sm:$0xff]   ;;  %v949_v1 = vmov 0  }
   0xd   :  { %794 = vmatprep.subr.bf16.mxu1 %v869_v15  ;;  %v710_v34 = vcombine.high %v15_v32, %v15_v32  ;;  %v888_v35 = vld [vmem:[%s1201_s1 + $0xc0] ss:$12 sps:$4 sm:$0xff]   ;;  %v709_v37 = vcombine.low %v15_v32, %v15_v32  ;;  %v893_v39 = vld [vmem:[%s1201_s1 + $0xd8] ss:$12 sps:$4 sm:$0xff]   ;;  %v900_v43 = vld [vmem:[%s1201_s1 + $0xf0] ss:$12 sps:$4 sm:$0xff]  }
   0xe   :  { %v898_v41 = vld [vmem:[%s1201_s1 + $0xf4] ss:$12 sps:$4 sm:$0xff]   ;;  %v902_v44 = vld [vmem:[%s1201_s1 + $0x10c] ss:$12 sps:$4 sm:$0xff]   ;;  %v906_v47 = vld [vmem:[%s1201_s1 + $0x124] ss:$12 sps:$4 sm:$0xff]  }
   0xf   :  { %532 = vmatpush1.bf16.msra.mxu0 %v863_v11  ;;  %639 = vmatprep.mubr.bf16.mxu1 %v710_v34  ;;  %v901_v42 = vld [vmem:[%s1201_s1 + $0x1a0] ss:$12 sps:$4 sm:$0xff]   ;;  %v905_v45 = vld [vmem:[%s1201_s1 + $0x1b8] ss:$12 sps:$4 sm:$0xff]   ;;  %v904_v46 = vld [vmem:[%s1201_s1 + $0x108] ss:$12 sps:$4 sm:$0xff]  }
  0x10   :  { %533 = vmatprep.subr.bf16.mxu0 %v866_v14  ;;  %795 = vmatpush3.bf16.msra.mxu1 %v870_v16  ;;  %v909_v48 = vld [vmem:[%s1201_s1 + $0x1d0] ss:$12 sps:$4 sm:$0xff]   ;;  %v908_v49 = vld [vmem:[%s1201_s1 + $0x120] ss:$12 sps:$4 sm:$0xff]   ;;  %v913_v51 = vld [vmem:[%s1201_s1 + $0x1e8] ss:$12 sps:$4 sm:$0xff]  }
  0x11   :  { %796 = vmatprep.subr.bf16.mxu1 %v874_v19  ;;  %557 = vmatprep.mubr.bf16.mxu0 %v710_v34  ;;  %v910_v50 = vld [vmem:[%s1201_s1 + $0x13c] ss:$12 sps:$4 sm:$0xff]   ;;  %v912_v52 = vld [vmem:[%s1201_s1 + $0x138] ss:$12 sps:$4 sm:$0xff]   ;;  %v914_v53 = vld [vmem:[%s1201_s1 + $0x154] ss:$12 sps:$4 sm:$0xff]   ;;  %v115_v19 = vlaneseq }
  0x12   :  { %v917_v54 = vld [vmem:[%s1201_s1 + $0x200] ss:$12 sps:$4 sm:$0xff]   ;;  %v916_v55 = vld [vmem:[%s1201_s1 + $0x150] ss:$12 sps:$4 sm:$0xff]   ;;  %v921_v57 = vld [vmem:[%s1201_s1 + $0x218] ss:$12 sps:$4 sm:$0xff]  }
  0x13   :  { %534 = vmatpush1.bf16.msra.mxu0 %v868_v17  ;;  %v918_v56 = vld [vmem:[%s1201_s1 + $0x16c] ss:$12 sps:$4 sm:$0xff]   ;;  %v920_v58 = vld [vmem:[%s1201_s1 + $0x168] ss:$12 sps:$4 sm:$0xff]   ;;  %v924_v59 = vld [vmem:[%s1201_s1 + $0x184] ss:$12 sps:$4 sm:$0xff]  }
  0x14   :  { %535 = vmatprep.subr.bf16.mxu0 %v871_v18  ;;  %797 = vmatpush3.bf16.msra.mxu1 %v875_v21  ;;  %v925_v60 = vld [vmem:[%s1201_s1 + $0x230] ss:$12 sps:$4 sm:$0xff]   ;;  %v922_v61 = vld [vmem:[%s1201_s1 + $0x180] ss:$12 sps:$4 sm:$0xff]   ;;  %v896_v63 = vld [vmem:[%s1202_s0 + $0x8] ss:$0 sps:$4 sm:$0xff]  }
  0x15   :  { %798 = vmatprep.subr.bf16.mxu1 %v879_v23  ;;  %v928_v62 = vld [vmem:[%s1201_s1 + $0x19c] ss:$12 sps:$4 sm:$0xff]   ;;  %v926_v0 = vld [vmem:[%s1201_s1 + $0x198] ss:$12 sps:$4 sm:$0xff]   ;;  %v931_v2 = vld [vmem:[%s1201_s1 + $0x1b4] ss:$12 sps:$4 sm:$0xff]  }
  0x16   :  { %v929_v3 = vld [vmem:[%s1201_s1 + $0x1b0] ss:$12 sps:$4 sm:$0xff]   ;;  %v934_v4 = vld [vmem:[%s1201_s1 + $0x1cc] ss:$12 sps:$4 sm:$0xff]   ;;  %v932_v5 = vld [vmem:[%s1201_s1 + $0x1c8] ss:$12 sps:$4 sm:$0xff]  }
  0x17   :  { %536 = vmatpush1.bf16.msra.mxu0 %v873_v20  ;;  %v937_v6 = vld [vmem:[%s1201_s1 + $0x1e4] ss:$12 sps:$4 sm:$0xff]   ;;  %v935_v7 = vld [vmem:[%s1201_s1 + $0x1e0] ss:$12 sps:$4 sm:$0xff]   ;;  %v940_v8 = vld [vmem:[%s1201_s1 + $0x1fc] ss:$12 sps:$4 sm:$0xff]  }
  0x18   :  { %537 = vmatprep.subr.bf16.mxu0 %v876_v22  ;;  %799 = vmatpush3.bf16.msra.mxu1 %v880_v25  ;;  %v938_v9 = vld [vmem:[%s1201_s1 + $0x1f8] ss:$12 sps:$4 sm:$0xff]   ;;  %v943_v10 = vld [vmem:[%s1201_s1 + $0x214] ss:$12 sps:$4 sm:$0xff]   ;;  %v941_v11 = vld [vmem:[%s1201_s1 + $0x210] ss:$12 sps:$4 sm:$0xff]  }
  0x19   :  { %800 = vmatprep.subr.bf16.mxu1 %v884_v26  ;;  %v946_v12 = vld [vmem:[%s1201_s1 + $0x22c] ss:$12 sps:$4 sm:$0xff]   ;;  %v944_v13 = vld [vmem:[%s1201_s1 + $0x228] ss:$12 sps:$4 sm:$0xff]   ;;  %v116_v20 = vshrl.u32 %v115_v19, 7 }
  0x1a   :  { %v113_v22 = vld [vmem:[%s1203_s2] sm:$0x7] }
  0x1b   :  { %538 = vmatpush1.bf16.msra.mxu0 %v878_v24  ;;  %v125_v21 = vsub.s32 2, %v116_v20  ;;  %v117_v32 = vsub.s32 0, %v116_v20 }
  0x1c   :  { %539 = vmatprep.subr.bf16.mxu0 %v881_v27  ;;  %801 = vmatpush3.bf16.msra.mxu1 %v885_v29 }
  0x1d   :  { %802 = vmatprep.subr.bf16.mxu1 %v889_v30  ;;  %v126_v23 = vrot.slane %v113_v22, %v125_v21  ;;  %v118_v34 = vrot.slane %v113_v22, %v117_v32 }
  0x1f   :  { %540 = vmatpush1.bf16.msra.mxu0 %v883_v28 }
  0x20   :  { %541 = vmatprep.subr.bf16.mxu0 %v886_v31  ;;  %803 = vmatpush3.bf16.msra.mxu1 %v890_v33  ;;  %v121_v33 = vsub.s32 1, %v116_v20 }
  0x21   :  { %819 = vmatprep.subr.bf16.mxu1 %v947_v40 }
  0x23   :  { %542 = vmatpush1.bf16.msra.mxu0 %v888_v35  ;;  %640 = vmatmul.mubr.bf16.vlgmr.msra.gmra.mrb[0].mxu1 %v709_v37  ;;  %v122_v35 = vrot.slane %v113_v22, %v121_v33 }
  0x24   :  { %543 = vmatprep.subr.bf16.mxu0 %v891_v36  ;;  %820 = vmatpush3.bf16.msra.mxu1 %v897_v38 }
  0x25   :  { %835 = vmatprep.mubr.msk.bf16.mxu1 %vm948_vm0, %v947_v40  ;;  %821 = vmatprep.subr.bf16.mxu1 %v947_v40 }
  0x27   :  { %544 = vmatpush1.bf16.msra.mxu0 %v893_v39 }
  0x28   :  { %545 = vmatprep.subr.bf16.mxu0 %v898_v41  ;;  %822 = vmatpush3.bf16.msra.mxu1 %v901_v42 }
  0x29   :  { %823 = vmatprep.subr.bf16.mxu1 %v947_v40 }
  0x2b   :  { %546 = vmatpush1.bf16.msra.mxu0 %v900_v43 }
  0x2c   :  { %547 = vmatprep.subr.bf16.mxu0 %v902_v44  ;;  %824 = vmatpush3.bf16.msra.mxu1 %v905_v45 }
  0x2d   :  { %825 = vmatprep.subr.bf16.mxu1 %v947_v40 }
  0x2f   :  { %548 = vmatpush1.bf16.msra.mxu0 %v904_v46 }
  0x30   :  { %549 = vmatprep.subr.bf16.mxu0 %v906_v47  ;;  %826 = vmatpush3.bf16.msra.mxu1 %v909_v48 }
  0x31   :  { %827 = vmatprep.subr.bf16.mxu1 %v947_v40 }
  0x33   :  { %550 = vmatpush1.bf16.msra.mxu0 %v908_v49 }
  0x34   :  { %551 = vmatprep.subr.bf16.mxu0 %v910_v50  ;;  %828 = vmatpush3.bf16.msra.mxu1 %v913_v51 }
  0x35   :  { %829 = vmatprep.subr.bf16.mxu1 %v947_v40 }
  0x37   :  { %552 = vmatpush1.bf16.msra.mxu0 %v912_v52 }
  0x38   :  { %553 = vmatprep.subr.bf16.mxu0 %v914_v53  ;;  %830 = vmatpush3.bf16.msra.mxu1 %v917_v54 }
  0x39   :  { %831 = vmatprep.subr.bf16.mxu1 %v947_v40 }
  0x3b   :  { %554 = vmatpush1.bf16.msra.mxu0 %v916_v55 }
  0x3c   :  { %555 = vmatprep.subr.bf16.mxu0 %v918_v56  ;;  %832 = vmatpush3.bf16.msra.mxu1 %v921_v57 }
  0x3d   :  { %833 = vmatprep.subr.bf16.mxu1 %v947_v40 }
  0x3f   :  { %556 = vmatpush1.bf16.msra.mxu0 %v920_v58 }
  0x40   :  { %566 = vmatprep.subr.bf16.mxu0 %v924_v59  ;;  %834 = vmatpush3.bf16.msra.mxu1 %v925_v60 }
  0x42   :  { %558 = vmatmul.mubr.bf16.vlgmr.msra.gmra.mrb[0].mxu0 %v709_v37 }
  0x43   :  { %567 = vmatpush1.bf16.msra.mxu0 %v922_v61  ;;  %598 = vmatprep.mubr.bf16.mxu0 %v949_v1 }
  0x44   :  { %568 = vmatprep.subr.bf16.mxu0 %v928_v62  ;;  %836 = vmatmul.mubr.bf16.vlgmr.msra.gmra.mrb[4].mxu1 %v896_v63 }
  0x47   :  { %569 = vmatpush1.bf16.msra.mxu0 %v926_v0 }
  0x48   :  { %570 = vmatprep.subr.bf16.mxu0 %v931_v2 }
  0x4b   :  { %571 = vmatpush1.bf16.msra.mxu0 %v929_v3 }
  0x4c   :  { %572 = vmatprep.subr.bf16.mxu0 %v934_v4 }
  0x4f   :  { %573 = vmatpush1.bf16.msra.mxu0 %v932_v5 }
  0x50   :  { %574 = vmatprep.subr.bf16.mxu0 %v937_v6 }
  0x53   :  { %575 = vmatpush1.bf16.msra.mxu0 %v935_v7 }
  0x54   :  { %576 = vmatprep.subr.bf16.mxu0 %v940_v8 }
  0x57   :  { %577 = vmatpush1.bf16.msra.mxu0 %v938_v9 }
  0x58   :  { %578 = vmatprep.subr.bf16.mxu0 %v943_v10 }
  0x5b   :  { %579 = vmatpush1.bf16.msra.mxu0 %v941_v11 }
  0x5c   :  { %580 = vmatprep.subr.bf16.mxu0 %v946_v12 }
  0x5f   :  { %581 = vmatpush1.bf16.msra.mxu0 %v944_v13 }
  0x62   :  { %599 = vmatmul.mubr.bf16.vlgmr.msra.gmra.mrb[0].mxu0 %v896_v63 }
  0xf6   :  { %v804_v14 = vpop.f32.mrb[0].mxu1 }
  0xf7   :  { %v805_v15 = vpop.f32.mrb[1].mxu1 }
  0xf8   :  { %v806_v16 = vadd.f32 %v805_v15, %v804_v14  ;;  %v807_v17 = vpop.f32.mrb[2].mxu1 }
  0xf9   :  { %v808_v18 = vpop.f32.mrb[3].mxu1 }
  0xfa   :  { %v642_v24 = vadd.f32 %v806_v16, %v126_v23 }
 0x117   :  { %v681_v25 = vpop.f32.mrb[4].mxu1 }
 0x118   :  { %v682_v26 = vadd.f32 %v681_v25, %v642_v24  ;;  %v837_v27 = vpop.f32.mrb[5].mxu1 }
 0x119   :  { %v684_v28 = vpop.f32.mrb[6].mxu1 }
 0x11a   :  { %v689_v29 = vmin.f32 %v682_v26, 4.0  ;;  %v838_v30 = vpop.f32.mrb[7].mxu1 }
 0x11c   :  { %v787_v31 = vpack.c.bf16 %v689_v29, %v689_v29 }
 0x11e   :  { %704 = vst [vmem:[%s1204_s3 + $0x8] sm:$0xf] %v787_v31 }
 0x135   :  { %v600_v36 = vpop.f32.mrb[0].mxu0 }
 0x136   :  { %v839_v37 = vadd.f32 %v600_v36, %v118_v34  ;;  %v602_v38 = vpop.f32.mrb[1].mxu0 }
 0x137   :  { %v840_v39 = vadd.f32 %v602_v38, %v122_v35  ;;  %v604_v40 = vpop.f32.mrb[2].mxu0 }
 0x138   :  { %v687_v41 = vmin.f32 %v839_v37, 4.0  ;;  %v605_v42 = vpop.f32.mrb[3].mxu0 }
 0x139   :  { %v688_v43 = vmin.f32 %v840_v39, 4.0 }
 0x13b   :  { %v786_v44 = vpack.c.bf16 %v688_v43, %v687_v41 }
 0x13d   :  { %703 = vst [vmem:[%s1204_s3] sm:$0xff] %v786_v44 }

</bundles_post_ra>
